<compile_context>
chip_gen: v7x
topology: tpu7x:2x2x1
jax: 0.10.0
libtpu: 0.0.40
codegen_flags: <defaults>
</compile_context>

<pallas_src>
import functools

import jax
import jax.numpy as jnp
from jax.experimental import pallas as pl
from jax.experimental.pallas import tpu as pltpu


def _make_reorg_kernel(s, C, Th, Tw):
    """Kernel body closed over the static stride / shape constants."""
    sC = s * C

    def kernel(x_ref, o_ref):
        # x_ref: (1, Th, s, Tw, s*C)   -- (batch, hh-tile, s1, ww-tile, s2*C + c)
        # o_ref: (1, Th, Tw, s*s*C)    -- channel index = (s1*s + s2)*C + c
        for s1 in range(s):                          # static python loop (s is tiny)
            v = x_ref[:, :, s1:s1 + 1, :, :]         # (1, Th, 1, Tw, s*C)
            v = v.reshape(1, Th, Tw, sC)             # drop unit non-minor dim (layout no-op)
            # One wide s*C-lane store per s1 (the s2 loop is collapsed into the lane dim).
            o_ref[:, :, :, pl.ds(s1 * sC, sC)] = v

    return kernel


def _pick_tiles(hh, ww, unit_bytes, target_bytes=2 * 1024 * 1024):
    """Pick (Th, Tw) block tiles whose VMEM block stays around `target_bytes`.

    unit_bytes = bytes of a single (Th=1, Tw=1) block = s*s*C*itemsize.
    Prefer full ww (longest contiguous stores); only split ww when a single
    (Th=1, Tw=ww) block overshoots the target, and then keep Tw a multiple of 8
    (second-minor block-dim constraint) and a divisor of ww.
    """
    tw = ww
    if unit_bytes * ww > target_bytes:
        cands = [d for d in range(8, ww, 8)
                 if ww % d == 0 and unit_bytes * d <= target_bytes]
        tw = max(cands) if cands else ww
    th = max(1, min(hh, target_bytes // max(1, unit_bytes * tw)))
    while hh % th:
        th -= 1
    return th, tw


@functools.partial(jax.jit, static_argnames=("stride",))
def reorg_pallas(x, stride):
    """NCHW -> NCHW reorg, matching reorg_layer.forward exactly."""
    B, C, H, W = x.shape
    s = int(stride)
    assert H % s == 0 and W % s == 0, \
        "reorg_layer requires H % stride == 0 and W % stride == 0"
    hh, ww = H // s, W // s
    itemsize = jnp.dtype(x.dtype).itemsize

    # --- plain-JAX layout glue (see TODO above) -----------------------------
    x_nhwc = jnp.transpose(x, (0, 2, 3, 1))            # NCHW -> NHWC
    x5 = x_nhwc.reshape(B, hh, s, ww, s * C)           # split H and W by stride (pure reshape)

    # --- tile hh (and ww if needed) so VMEM stays bounded --------------------
    unit_bytes = s * s * C * itemsize                  # bytes of a (Th=1, Tw=1) block
    Th, Tw = _pick_tiles(hh, ww, unit_bytes)
    n_h, n_w = hh // Th, ww // Tw

    # --- Pallas kernel: the reorg hot path ------------------------------------
    out_nhwc = pl.pallas_call(
        _make_reorg_kernel(s, C, Th, Tw),
        out_shape=jax.ShapeDtypeStruct((B, hh, ww, s * s * C), x.dtype),
        grid=(B, n_h, n_w),
        in_specs=[
            # minor two block dims are (Tw, s*C): s*C is always the full dim,
            # Tw is either full or a multiple of 8 -> always a legal tiling.
            pl.BlockSpec((1, Th, s, Tw, s * C), lambda b, h, w: (b, h, 0, w, 0)),
        ],
        out_specs=pl.BlockSpec((1, Th, Tw, s * s * C), lambda b, h, w: (b, h, w, 0)),
        compiler_params=pltpu.CompilerParams(
            dimension_semantics=("parallel", "parallel", "parallel"),
            vmem_limit_bytes=32 * 1024 * 1024,
        ),
        cost_estimate=pl.CostEstimate(
            flops=0,
            transcendentals=0,
            bytes_accessed=2 * B * C * H * W * itemsize,
        ),
    )(x5)

    # --- plain-JAX layout glue back to NCHW -----------------------------------
    return jnp.transpose(out_nhwc, (0, 3, 1, 2))       # (B, s*s*C, hh, ww)


def reorg_reference(x, s):
    """Direct transcription of the PyTorch forward (for verification)."""
    B, C, H, W = x.shape
    hh, ww = H // s, W // s
    y = x.reshape(B, C, hh, s, ww, s).transpose(0, 1, 2, 4, 3, 5)
    y = y.reshape(B, C, hh * ww, s * s).transpose(0, 1, 3, 2)
    y = y.reshape(B, C, s * s, hh, ww).transpose(0, 2, 1, 3, 4)
    return y.reshape(B, -1, hh, ww)


if __name__ == "__main__":
    key = jax.random.PRNGKey(0)

    # Primary check: shapes implied by the module (NCHW, stride 2).
    stride = 2
    x = jax.random.normal(key, (2, 4, 16, 16), dtype=jnp.float32)
    out = jax.block_until_ready(reorg_pallas(x, stride))
    ref = reorg_reference(x, stride)
    assert out.shape == (2, stride * stride * 4, 8, 8), out.shape
    assert out.dtype == x.dtype
    assert jnp.allclose(out, ref), "Pallas reorg (stride=2) does not match reference"

    # Secondary small check: different stride / channel count.
    key2 = jax.random.PRNGKey(0)
    x2 = jax.random.normal(key2, (1, 8, 12, 12), dtype=jnp.float32)
    out2 = jax.block_until_ready(reorg_pallas(x2, 3))
    ref2 = reorg_reference(x2, 3)
    assert out2.shape == (1, 3 * 3 * 8, 4, 4), out2.shape
    assert jnp.allclose(out2, ref2), "Pallas reorg (stride=3) does not match reference"

    print("KERNEL_OK")
</pallas_src>

<mosaic_0001>
module attributes {stable_mosaic.version = 11 : i64} {
  func.func @kernel(%arg0: i32, %arg1: i32, %arg2: i32, %arg3: memref<1x8x2x8x8xf32, #tpu.memory_space<vmem>>, %arg4: memref<1x8x8x16xf32, #tpu.memory_space<vmem>>) attributes {dimension_semantics = [#tpu.dimension_semantics<parallel>, #tpu.dimension_semantics<parallel>, #tpu.dimension_semantics<parallel>], iteration_bounds = array<i64: 2, 1, 1>, scalar_prefetch = 0 : i64, scratch_operands = 0 : i64, tpu.core_type = #tpu.core_type<tc>, window_params = [{transform_indices = @transform_0, window_bounds = array<i64: 1, 8, 2, 8, 8>}, {transform_indices = @transform_1, window_bounds = array<i64: 1, 8, 8, 16>}]} {
    %c0 = arith.constant 0 : index
    %c0_0 = arith.constant 0 : index
    %c0_1 = arith.constant 0 : index
    %c0_2 = arith.constant 0 : index
    %c0_3 = arith.constant 0 : index
    %0 = vector.load %arg3[%c0, %c0_0, %c0_1, %c0_2, %c0_3] : memref<1x8x2x8x8xf32, #tpu.memory_space<vmem>>, vector<1x8x1x8x8xf32>
    %1 = vector.shape_cast %0 : vector<1x8x1x8x8xf32> to vector<1x8x8x8xf32>
    %c0_4 = arith.constant 0 : index
    %c0_5 = arith.constant 0 : index
    %c0_6 = arith.constant 0 : index
    %c0_7 = arith.constant 0 : index
    %2 = vector.load %arg4[%c0_4, %c0_5, %c0_6, %c0_7] : memref<1x8x8x16xf32, #tpu.memory_space<vmem>>, vector<1x8x8x8xf32>
    tpu.vector_store %arg4[%c0_4, %c0_5, %c0_6, %c0_7], %1 {strides = array<i32>} : memref<1x8x8x16xf32, #tpu.memory_space<vmem>>, vector<1x8x8x8xf32>,
    %c0_8 = arith.constant 0 : index
    %c0_9 = arith.constant 0 : index
    %c1 = arith.constant 1 : index
    %c0_10 = arith.constant 0 : index
    %c0_11 = arith.constant 0 : index
    %3 = vector.load %arg3[%c0_8, %c0_9, %c1, %c0_10, %c0_11] : memref<1x8x2x8x8xf32, #tpu.memory_space<vmem>>, vector<1x8x1x8x8xf32>
    %4 = vector.shape_cast %3 : vector<1x8x1x8x8xf32> to vector<1x8x8x8xf32>
    %c0_12 = arith.constant 0 : index
    %c0_13 = arith.constant 0 : index
    %c0_14 = arith.constant 0 : index
    %c8 = arith.constant 8 : index
    %5 = vector.load %arg4[%c0_12, %c0_13, %c0_14, %c8] : memref<1x8x8x16xf32, #tpu.memory_space<vmem>>, vector<1x8x8x8xf32>
    tpu.vector_store %arg4[%c0_12, %c0_13, %c0_14, %c8], %4 {strides = array<i32>} : memref<1x8x8x16xf32, #tpu.memory_space<vmem>>, vector<1x8x8x8xf32>,
    return
  }
  func.func @transform_0(%arg0: i32, %arg1: i32, %arg2: i32) -> (i32, i32, i32, i32, i32) {
    %c0_i32 = arith.constant 0 : i32
    %c0_i32_0 = arith.constant 0 : i32
    %c0_i32_1 = arith.constant 0 : i32
    return %arg0, %arg1, %c0_i32, %arg2, %c0_i32_0 : i32, i32, i32, i32, i32
  }
  func.func @transform_1(%arg0: i32, %arg1: i32, %arg2: i32) -> (i32, i32, i32, i32) {
    %c0_i32 = arith.constant 0 : i32
    %c0_i32_0 = arith.constant 0 : i32
    return %arg0, %arg1, %arg2, %c0_i32 : i32, i32, i32, i32
  }
}

</mosaic_0001>

<bundles_post_ra>
// kernel: reorg_pallas.1
= control target key start
LH: loop header
LB: loop body
LE: loop exit
PB: predicated region body
PF: predicated region fallthrough
CT: control target
= control target key end

     0   :  { %6 = vsyncpa [#allocation3], 0  ;;  %s696_s0 = inlined_call_operand.vmem [shape: f32[2,8,2,8,8], index: 0, kind: input, shape index: {}]   ;;  %s697_s1 = inlined_call_operand.hbm [shape: f32[2,8,8,16], index: 1, kind: output, shape index: {}]  }
   0x1   :  { %8 = vsyncpa [#allocation3 + $0x1], 0  ;;  %s515_s6 = smov 0   ;;  %s517_s7 = smov 0  }
   0x2   :  { %s519_s8 = smov 0   ;;  %s521_s9 = smov 0  }
   0x3   :  { %s523_s10 = smov 0   ;;  %s525_s11 = smov 0  }
   0x4 LB: > { %s342_s12 = sadd.s32 4294967295, %s500_s11   ;;  %s343_s13 = sadd.s32 4294967294, %s500_s11   ;;  %s500_s11 = sphi %s525_s11, %s14_s11   ;;  %s496_s10 = sphi %s523_s10, %s704_s10   ;;  %s492_s9 = sphi %s521_s9, %s703_s9   ;;  %s488_s8 = sphi %s519_s8, %s702_s8   ;;  %s484_s7 = sphi %s517_s7, %s701_s7   ;;  %s480_s6 = sphi %s515_s6, %s700_s6  }
   0x5   : > { %s33_s14 = sadd.s32 1, %s496_s10  ;;  %s74_s15 = sadd.s32 1, %s488_s8 }
   0x6   : > { %p35_p0 = scmp.ge.s32.totalorder %s33_s14, 2  ;;  %p84_p1 = scmp.ne.s32.totalorder %s488_s8, %s484_s7 }
   0x7   : > { %p85_p2 = scmp.eq.s32.totalorder %s342_s12, 1  ;;  %p90_p3 = scmp.ne.s32.totalorder %s484_s7, %s480_s6 }
   0x8   : > { %s706_s14 = smov (%p35_p0, %s33_s14), 0  ;;  %p91_p5 = scmp.eq.s32.totalorder %s343_s13, 1 }
   0x9   : > { %p555_p4 = por %p85_p2, %p84_p1  ;;  %s67_s17 = ssub.s32 %s496_s10, %s706_s14 }
   0xa   : > { %p346_p6 = scmp.ge.s32.totalorder %s500_s11, 1  ;;  %p72_p7 = scmp.eq.s32.totalorder %s67_s17, 0 }
   0xb   : > { %p562_p8 = por %p91_p5, %p90_p3  ;;  %p126_p9 = scmp.lt.s32.totalorder %s500_s11, 3 }
   0xc   : > { %s568_s19 = scalar_select %p72_p7, %s488_s8, %s74_s15  }
   0xd   : > { %p127_p10 = pnand %p346_p6, %p126_p9 }
   0xe   : > { %p155_p11 = scmp.lt.s32.totalorder (!%p127_p10), %s492_s9, 1  ;;  %s151_s20 = sand.u32 (!%p127_p10), 1, %s484_s7   ;;  %vm177_vm0 = vcmask (!%p127_p10), 64512   ;;  %vm227_vm1 = vcmask (!%p127_p10), 130112  }
   0xf   : > { %130 = sbr.rel (%p127_p10) target bundleno = 170 (0xaa), region = 24  ;;  %s347_s23 = sshll.u32 (!%p127_p10), %s151_s20, 6 }
  0x10   : > { %s502_s27 = smov (!%p127_p10), 8   ;;  %s589_s28 = scalar_lea.vmem (!%p127_p10), [#allocation2], %s347_s23 }
  0x11   : > { %s364_s29 = sshll.u32 (!%p127_p10), %s492_s9, 10  ;;  %s253_s30 = sshll.u32 (!%p127_p10), %s589_s28, 4  ;;  %s641_s30 = int_to_ptr.vmem [resolvable:$true] %s253_s30 }
  0x12   : > { %s639_s4 = scalar_lea.hbm (!%p127_p10), %s697_s1, %s364_s29  ;;  %s649_s5 = scalar_lea.sflag (!%p127_p10), [#allocation3], %s151_s20 }
  0x13   : > { %s503_s12 = smov (!%p127_p10), [#allocation2]  }
  0x14   : > { %s426_s13 = sshll.u32 (!%p127_p10), %s503_s12, 4  ;;  %s427_s13 = int_to_ptr.vmem [resolvable:$false] %s426_s13 }
  0x15   : > { %s428_s15 = scalar_lea.vmem (!%p127_p10), %s427_s13, 2048  ;;  %p429_p1 = scmp.lt.s32.totalorder (!%p127_p10), %s641_s30, %s427_s13 }
  0x16   : > { %s156_s21 = scalar_select %p155_p11, %s492_s9, 1 }
  0x17   : > { %s422_s9 = scalar_lea.vmem %s641_s30, 1024 }
  0x18   : > { %s363_s22 = sshll.u32 %s156_s21, 7  ;;  %p423_p12 = scmp.ne.s32.totalorder %s641_s30, %s422_s9 }
  0x19   : > { %s578_s26 = scalar_lea.vmem %s696_s0, %s363_s22  ;;  %p430_p2 = scmp.lt.s32.totalorder %s428_s15, %s422_s9 }
  0x1a   : > { %v352_v0 = vld [vmem:[%s578_s26 + $0x28] sm:$0xff]  ;;  %v353_v2 = vld [vmem:[%s578_s26 + $0x38] sm:$0xff]  ;;  %v171_v4 = vld [vmem:[%s578_s26 + $0x20] sm:$0xff]  ;;  %p424_p13 = pnand %p423_p12, %p555_p4 }
  0x1b   : > { %v350_v1 = vld [vmem:[%s578_s26 + $0x8] sm:$0xff]  ;;  %207 = vrot.lane.b32.xlu1 %v352_v0, %s502_s27  ;;  %v351_v3 = vld [vmem:[%s578_s26 + $0x18] sm:$0xff]  ;;  %v169_v5 = vld [vmem:[%s578_s26] sm:$0xff]  ;;  %p431_p3 = por %p430_p2, %p429_p1 }
  0x1c   : > { %203 = vrot.lane.b32.xlu0 %v350_v1, %s502_s27  ;;  %v172_v6 = vld [vmem:[%s578_s26 + $0x30] sm:$0xff]  ;;  %180 = vst.msk [vmem:[%s589_s28 + $0x10] sm:$0xff] %vm177_vm0, %v171_v4  ;;  %178 = vst.msk [vmem:[%s589_s28] sm:$0xff] %vm177_vm0, %v169_v5  ;;  %p425_p0 = pneg %p424_p13 }
  0x1d   : > { %181 = vst.msk [vmem:[%s589_s28 + $0x18] sm:$0xff] %vm177_vm0, %v172_v6  ;;  %v170_v7 = vld [vmem:[%s578_s26 + $0x10] sm:$0xff]  ;;  %v173_v9 = vld [vmem:[%s578_s26 + $0x40] sm:$0xff]  ;;  %v355_v12 = vld [vmem:[%s578_s26 + $0x58] sm:$0xff] }
  0x1e   : > { %v174_v8 = vld [vmem:[%s578_s26 + $0x50] sm:$0xff]  ;;  %179 = vst.msk [vmem:[%s589_s28 + $0x8] sm:$0xff] %vm177_vm0, %v170_v7  ;;  %182 = vst.msk [vmem:[%s589_s28 + $0x20] sm:$0xff] %vm177_vm0, %v173_v9  ;;  %v175_v11 = vld [vmem:[%s578_s26 + $0x60] sm:$0xff]  ;;  %p432_p5 = pnand %p431_p3, %p425_p0 }
  0x1f   : > { %209 = vrot.lane.b32.xlu1 %v353_v2, %s502_s27  ;;  %183 = vst.msk [vmem:[%s589_s28 + $0x28] sm:$0xff] %vm177_vm0, %v174_v8  ;;  %v176_v10 = vld [vmem:[%s578_s26 + $0x70] sm:$0xff]  ;;  %v354_v13 = vld [vmem:[%s578_s26 + $0x48] sm:$0xff] }
  0x20   : > { %205 = vrot.lane.b32.xlu0 %v351_v3, %s502_s27  ;;  %185 = vst.msk [vmem:[%s589_s28 + $0x38] sm:$0xff] %vm177_vm0, %v176_v10  ;;  %184 = vst.msk [vmem:[%s589_s28 + $0x30] sm:$0xff] %vm177_vm0, %v175_v11  ;;  %v357_v14 = vld [vmem:[%s578_s26 + $0x78] sm:$0xff] }
  0x21   : > { %v356_v15 = vld [vmem:[%s578_s26 + $0x68] sm:$0xff] }
  0x23   : > { %213 = vrot.lane.b32.xlu1 %v355_v12, %s502_s27 }
  0x24   : > { %211 = vrot.lane.b32.xlu0 %v354_v13, %s502_s27 }
  0x27   : > { %217 = vrot.lane.b32.xlu1 %v357_v14, %s502_s27 }
  0x28   : > { %215 = vrot.lane.b32.xlu0 %v356_v15, %s502_s27 }
  0x8d   : > { %v208_v16 = vpop.permute.xlu1 %207 }
  0x8e   : > { %v204_v17 = vpop.permute.xlu0 %203  ;;  %230 = vst.msk [vmem:[%s589_s28 + $0x10] sm:$0xff] %vm227_vm1, %v208_v16 }
  0x8f   : > { %228 = vst.msk [vmem:[%s589_s28] sm:$0xff] %vm227_vm1, %v204_v17 }
  0x91   : > { %v210_v18 = vpop.permute.xlu1 %209 }
  0x92   : > { %v206_v19 = vpop.permute.xlu0 %205  ;;  %231 = vst.msk [vmem:[%s589_s28 + $0x18] sm:$0xff] %vm227_vm1, %v210_v18 }
  0x93   : > { %229 = vst.msk [vmem:[%s589_s28 + $0x8] sm:$0xff] %vm227_vm1, %v206_v19 }
  0x95   : > { %v214_v20 = vpop.permute.xlu1 %213 }
  0x96   : > { %v212_v21 = vpop.permute.xlu0 %211  ;;  %233 = vst.msk [vmem:[%s589_s28 + $0x28] sm:$0xff] %vm227_vm1, %v214_v20 }
  0x97   : > { %232 = vst.msk [vmem:[%s589_s28 + $0x20] sm:$0xff] %vm227_vm1, %v212_v21 }
  0x99   : > { %v218_v22 = vpop.permute.xlu1 %217 }
  0x9a   : > { %v216_v23 = vpop.permute.xlu0 %215  ;;  %235 = vst.msk [vmem:[%s589_s28 + $0x38] sm:$0xff] %vm227_vm1, %v218_v22 }
  0x9b   : > { %234 = vst.msk [vmem:[%s589_s28 + $0x30] sm:$0xff] %vm227_vm1, %v216_v23 }
  0x9c   : > { %435 = shalt.err (!%p432_p5)
}
  0x9d   : > { %s436_s17 = scalar_lea.hbm %s639_s4, 1024  ;;  %s440_s22 = scalar_lea.hbm %s697_s1, 2048 }
  0x9e   : > { %p437_p6 = scmp.ne.s32.totalorder %s639_s4, %s436_s17  ;;  %p441_p10 = scmp.lt.u32.totalorder %s639_s4, %s697_s1 }
  0x9f   : > { %p442_p11 = scmp.lt.u32.totalorder %s440_s22, %s436_s17  ;;  %p444_p13 = scmp.lt.u32.totalorder %s436_s17, %s639_s4 }
  0xa0   : > { %p438_p7 = pnand %p437_p6, %p555_p4 }
  0xa1   : > { %p443_p12 = por %p442_p11, %p441_p10 }
  0xa2   : > { %p439_p9 = pneg %p438_p7 }
  0xa3   : > { %p445_p0 = por %p444_p13, %p443_p12 }
  0xa5   : > { %p446_p1 = pnand %p445_p0, %p439_p9 }
  0xa7   : > { %449 = shalt.err (!%p446_p1)
}
  0xa8   : > { %s504_s25 = smov 128  }
  0xa9   : > { %365 = dma.vmem_to_hbm [thread:$0]  (%p555_p4), %s641_s30, 1024, %s639_s4, %s649_s5, %s504_s25, %s504_s25, %s502_s27  }
  0xaa PF: > { %p371_p2 = scmp.ge.s32.totalorder %s500_s11, 2  ;;  %s268_s26 = sand.u32 1, %s480_s6  }
  0xab   : > { %s269_s28 = scalar_lea.sflag [#allocation3], %s268_s26 }
  0xac   : > { %p368_p3 = pnand %p371_p2, %p562_p8 }
  0xae   : > { %475 = dma.done.wait (!%p368_p3), %s269_s28, 1024  }
  0xaf   : > { %477 = vsyncadd (!%p368_p3), %s269_s28, 4294966272  ;;  %s14_s11 = sadd.s32 1, %s500_s11   ;;  %s700_s6 = smov %s484_s7 }
  0xb0   : > { %p11_p5 = scmp.ge.s32.totalorder %s14_s11, 4   ;;  %s701_s7 = smov %s488_s8 }
  0xb1   : > { %s702_s8 = smov %s568_s19  ;;  %s703_s9 = smov %s496_s10 }
  0xb2   : > { %s704_s10 = smov %s706_s14  ;;  %13 = sbr.rel (!%p11_p5) target bundleno = 4 (0x4), region = 60 }
  0xb9   :  { %274 = vsyncpa [#allocation3], 1 }
  0xba   :  { %276 = vsyncpa [#allocation3 + $0x1], 1 }

</bundles_post_ra>
